<compile_context>
chip_gen: v5e
topology: v5e:2x2
jax: 0.10.0
libtpu: 0.0.40
codegen_flags: <defaults>
</compile_context>

<pallas_src>
import functools

import jax
import jax.numpy as jnp
from jax import lax
from jax.experimental import pallas as pl
from jax.experimental.pallas import tpu as pltpu


def _channel_attention_kernel(x_ref, w1_ref, w2_ref, o_ref,
                              sum_acc, max_acc, *, hw_total, tn):
    # x_ref: (TN, C, THW) ; w1_ref: (C, hidden) ; w2_ref: (hidden, C)
    # sum_acc / max_acc: (TN, C) f32 scratch, resident across the HW axis.
    k = pl.program_id(1)
    n_k = pl.num_programs(1)
    thw = x_ref.shape[-1]

    @pl.when(k == 0)
    def _init():
        sum_acc[...] = jnp.zeros_like(sum_acc)
        max_acc[...] = jnp.full_like(max_acc, -jnp.inf)

    x = x_ref[...].astype(jnp.float32)                      # (TN, C, THW)

    if hw_total % thw != 0:
        # Last HW tile extends past the array: mask padded lanes.
        pos = k * thw + lax.broadcasted_iota(jnp.int32, (1, 1, thw), 2)
        valid = pos < hw_total
        x_sum = jnp.where(valid, x, 0.0)
        x_max = jnp.where(valid, x, -jnp.inf)
    else:
        x_sum = x
        x_max = x

    sum_acc[...] = sum_acc[...] + jnp.sum(x_sum, axis=-1)   # (TN, C)
    max_acc[...] = jnp.maximum(max_acc[...], jnp.max(x_max, axis=-1))

    @pl.when(k == n_k - 1)
    def _finalize():
        avg = sum_acc[...] * (1.0 / float(hw_total))        # (TN, C)
        mx = max_acc[...]                                   # (TN, C)
        # Fuse the two FC passes: one (2*TN, C) @ (C, hidden) and one
        # (2*TN, hidden) @ (hidden, C) instead of 4 single-row matmuls.
        pooled = jnp.concatenate([avg, mx], axis=0)         # (2*TN, C)
        w1 = w1_ref[...].astype(jnp.float32)                # (C, hidden)
        w2 = w2_ref[...].astype(jnp.float32)                # (hidden, C)
        h = jnp.maximum(
            jnp.dot(pooled, w1, preferred_element_type=jnp.float32), 0.0)
        y = jnp.dot(h, w2, preferred_element_type=jnp.float32)  # (2*TN, C)
        out = jax.nn.sigmoid(y[:tn] + y[tn:])               # (TN, C)
        o_ref[...] = out.astype(o_ref.dtype)


def _choose_tiles(N, C, HW, itemsize, block_budget_bytes=8 * 1024 * 1024):
    """Pick (TN, THW) so one input block stays under ~8 MiB
    (double-buffered -> ~16 MiB, safe within v7x's 32 MiB scoped VMEM)."""
    bytes_per_sample = C * HW * itemsize
    if bytes_per_sample <= block_budget_bytes:
        # Whole feature map per sample fits: batch several samples per step.
        tn = max(1, min(N, block_budget_bytes // max(bytes_per_sample, 1)))
        tn = min(tn, 8)
        return tn, HW
    # Feature map too large for one block: tile HW (lane-multiple tiles) and
    # reduce with running-sum / running-max scratch.
    lanes = 512
    max_thw = max(lanes, (block_budget_bytes // (C * itemsize)) // lanes * lanes)
    return 1, min(HW, max_thw)


def channel_attention(x, w1, w2):
    """x: (N, C, H, W); w1: (hidden, C, 1, 1); w2: (C, hidden, 1, 1).

    Returns the sigmoid channel-attention map of shape (N, C, 1, 1).
    """
    N, C, H, W = x.shape
    hidden = w1.shape[0]
    HW = H * W
    x_flat = x.reshape(N, C, HW)

    TN, THW = _choose_tiles(N, C, HW, x_flat.dtype.itemsize)

    # 1x1 conv weights -> matmul weights (applied as row-block @ matrix).
    w1_mat = jnp.transpose(w1.reshape(hidden, C))   # (C, hidden)
    w2_mat = jnp.transpose(w2.reshape(C, hidden))   # (hidden, C)

    grid = (pl.cdiv(N, TN), pl.cdiv(HW, THW))
    kernel = functools.partial(_channel_attention_kernel, hw_total=HW, tn=TN)

    out = pl.pallas_call(
        kernel,
        out_shape=jax.ShapeDtypeStruct((N, C), x.dtype),
        grid_spec=pltpu.PrefetchScalarGridSpec(
            num_scalar_prefetch=0,
            grid=grid,
            in_specs=[
                pl.BlockSpec((TN, C, THW), lambda n, k: (n, 0, k)),
                pl.BlockSpec((C, hidden), lambda n, k: (0, 0)),
                pl.BlockSpec((hidden, C), lambda n, k: (0, 0)),
            ],
            out_specs=pl.BlockSpec((TN, C), lambda n, k: (n, 0)),
            scratch_shapes=[
                pltpu.VMEM((TN, C), jnp.float32),   # running sum
                pltpu.VMEM((TN, C), jnp.float32),   # running max
            ],
        ),
        compiler_params=pltpu.CompilerParams(
            dimension_semantics=("parallel", "arbitrary")),
    )(x_flat, w1_mat, w2_mat)

    return out.reshape(N, C, 1, 1)


def reference(x, w1, w2):
    """Pure-JAX reference matching the PyTorch forward semantics."""
    N, C, H, W = x.shape
    hidden = w1.shape[0]
    w1m = w1.reshape(hidden, C)
    w2m = w2.reshape(C, hidden)
    avg = jnp.mean(x, axis=(2, 3))                 # (N, C)
    mx = jnp.max(x, axis=(2, 3))                   # (N, C)

    def fc(v):
        h = jnp.maximum(v @ w1m.T, 0.0)
        return h @ w2m.T

    out = jax.nn.sigmoid(fc(avg) + fc(mx))
    return out.reshape(N, C, 1, 1)


if __name__ == "__main__":
    # Shapes: in_planes must be >= 16 (fc hardcodes //16); keep everything small.
    N, C, H, W = 2, 32, 16, 16
    hidden = C // 16

    key = jax.random.PRNGKey(0)
    kx, k1, k2 = jax.random.split(key, 3)
    x = jax.random.normal(kx, (N, C, H, W), dtype=jnp.float32)
    # Deterministic synthetic weights (Conv2d 1x1, bias=False shapes).
    w1 = jax.random.normal(k1, (hidden, C, 1, 1), dtype=jnp.float32) * 0.1
    w2 = jax.random.normal(k2, (C, hidden, 1, 1), dtype=jnp.float32) * 0.1

    out = channel_attention(x, w1, w2)
    out = jax.block_until_ready(out)

    ref = reference(x, w1, w2)
    assert out.shape == (N, C, 1, 1)
    assert jnp.allclose(out, ref, atol=1e-5, rtol=1e-5), "mismatch vs reference"

    print("KERNEL_OK")
</pallas_src>

<mosaic_0001>
module attributes {stable_mosaic.version = 11 : i64} {
  func.func @_channel_attention_kernel(%arg0: i32, %arg1: i32, %arg2: memref<2x32x256xf32, #tpu.memory_space<vmem>>, %arg3: memref<32x2xf32, #tpu.memory_space<vmem>>, %arg4: memref<2x32xf32, #tpu.memory_space<vmem>>, %arg5: memref<2x32xf32, #tpu.memory_space<vmem>>, %arg6: memref<2x32xf32, #tpu.memory_space<vmem>>, %arg7: memref<2x32xf32, #tpu.memory_space<vmem>>) attributes {dimension_semantics = [#tpu.dimension_semantics<parallel>, #tpu.dimension_semantics<arbitrary>], iteration_bounds = array<i64: 1, 1>, scalar_prefetch = 0 : i64, scratch_operands = 2 : i64, tpu.core_type = #tpu.core_type<tc>, window_params = [{transform_indices = @transform_0, window_bounds = array<i64: 2, 32, 256>}, {pipeline_mode = #tpu.pipeline_mode<synchronous>, transform_indices = @transform_1, window_bounds = array<i64: 32, 2>}, {pipeline_mode = #tpu.pipeline_mode<synchronous>, transform_indices = @transform_2, window_bounds = array<i64: 2, 32>}, {transform_indices = @transform_3, window_bounds = array<i64: 2, 32>}]} {
    %c0_i32 = arith.constant 0 : i32
    %0 = arith.cmpi eq, %arg1, %c0_i32 : i32
    %1 = arith.extui %0 : i1 to i32
    %c0_i32_0 = arith.constant 0 : i32
    %2 = arith.cmpi ne, %1, %c0_i32_0 : i32
    scf.if %2 {
      %cst_14 = arith.constant 0.000000e+00 : f32
      %15 = vector.broadcast %cst_14 : f32 to vector<2x32xf32>
      %c0_15 = arith.constant 0 : index
      %c0_16 = arith.constant 0 : index
      %16 = vector.load %arg6[%c0_15, %c0_16] : memref<2x32xf32, #tpu.memory_space<vmem>>, vector<2x32xf32>
      tpu.vector_store %arg6[%c0_15, %c0_16], %15 {strides = array<i32>} : memref<2x32xf32, #tpu.memory_space<vmem>>, vector<2x32xf32>,
      %cst_17 = arith.constant 0xFF800000 : f32
      %17 = vector.broadcast %cst_17 : f32 to vector<2x32xf32>
      %c0_18 = arith.constant 0 : index
      %c0_19 = arith.constant 0 : index
      %18 = vector.load %arg7[%c0_18, %c0_19] : memref<2x32xf32, #tpu.memory_space<vmem>>, vector<2x32xf32>
      tpu.vector_store %arg7[%c0_18, %c0_19], %17 {strides = array<i32>} : memref<2x32xf32, #tpu.memory_space<vmem>>, vector<2x32xf32>,
    } else {
    }
    %c0 = arith.constant 0 : index
    %c0_1 = arith.constant 0 : index
    %c0_2 = arith.constant 0 : index
    %3 = vector.load %arg2[%c0, %c0_1, %c0_2] : memref<2x32x256xf32, #tpu.memory_space<vmem>>, vector<2x32x256xf32>
    %c0_3 = arith.constant 0 : index
    %c0_4 = arith.constant 0 : index
    %4 = vector.load %arg6[%c0_3, %c0_4] : memref<2x32xf32, #tpu.memory_space<vmem>>, vector<2x32xf32>
    %cst = arith.constant dense<0.000000e+00> : vector<2x32xf32>
    %5 = vector.multi_reduction <add>, %3, %cst [2] : vector<2x32x256xf32> to vector<2x32xf32>
    %6 = arith.addf %4, %5 : vector<2x32xf32>
    %c0_5 = arith.constant 0 : index
    %c0_6 = arith.constant 0 : index
    %7 = vector.load %arg6[%c0_5, %c0_6] : memref<2x32xf32, #tpu.memory_space<vmem>>, vector<2x32xf32>
    tpu.vector_store %arg6[%c0_5, %c0_6], %6 {strides = array<i32>} : memref<2x32xf32, #tpu.memory_space<vmem>>, vector<2x32xf32>,
    %c0_7 = arith.constant 0 : index
    %c0_8 = arith.constant 0 : index
    %8 = vector.load %arg7[%c0_7, %c0_8] : memref<2x32xf32, #tpu.memory_space<vmem>>, vector<2x32xf32>
    %cst_9 = arith.constant dense<0xFF800000> : vector<2x32xf32>
    %9 = vector.multi_reduction <maximumf>, %3, %cst_9 [2] : vector<2x32x256xf32> to vector<2x32xf32>
    %10 = arith.maximumf %8, %9 : vector<2x32xf32>
    %c0_10 = arith.constant 0 : index
    %c0_11 = arith.constant 0 : index
    %11 = vector.load %arg7[%c0_10, %c0_11] : memref<2x32xf32, #tpu.memory_space<vmem>>, vector<2x32xf32>
    tpu.vector_store %arg7[%c0_10, %c0_11], %10 {strides = array<i32>} : memref<2x32xf32, #tpu.memory_space<vmem>>, vector<2x32xf32>,
    %c0_i32_12 = arith.constant 0 : i32
    %12 = arith.cmpi eq, %arg1, %c0_i32_12 : i32
    %13 = arith.extui %12 : i1 to i32
    %c0_i32_13 = arith.constant 0 : i32
    %14 = arith.cmpi ne, %13, %c0_i32_13 : i32
    scf.if %14 {
      %c0_14 = arith.constant 0 : index
      %c0_15 = arith.constant 0 : index
      %15 = vector.load %arg6[%c0_14, %c0_15] : memref<2x32xf32, #tpu.memory_space<vmem>>, vector<2x32xf32>
      %cst_16 = arith.constant 3.906250e-03 : f32
      %16 = vector.broadcast %cst_16 : f32 to vector<2x32xf32>
      %17 = arith.mulf %15, %16 : vector<2x32xf32>
      %c0_17 = arith.constant 0 : index
      %c0_18 = arith.constant 0 : index
      %18 = vector.load %arg7[%c0_17, %c0_18] : memref<2x32xf32, #tpu.memory_space<vmem>>, vector<2x32xf32>
      %19 = tpu.concatenate %17, %18 in 0 : vector<2x32xf32>, vector<2x32xf32> -> vector<4x32xf32>
      %c0_19 = arith.constant 0 : index
      %c0_20 = arith.constant 0 : index
      %20 = vector.load %arg3[%c0_19, %c0_20] : memref<32x2xf32, #tpu.memory_space<vmem>>, vector<32x2xf32>
      %c0_21 = arith.constant 0 : index
      %c0_22 = arith.constant 0 : index
      %21 = vector.load %arg4[%c0_21, %c0_22] : memref<2x32xf32, #tpu.memory_space<vmem>>, vector<2x32xf32>
      %cst_23 = arith.constant dense<0.000000e+00> : vector<4x2xf32>
      %22 = tpu.matmul %19, %20, %cst_23 {dimension_numbers = #tpu.dot_dimension_numbers<[1], [0], [0], [1], [0, 0, 1, 1], [], []>} : vector<4x32xf32>, vector<32x2xf32>, vector<4x2xf32> -> vector<4x2xf32>
      %cst_24 = arith.constant 0.000000e+00 : f32
      %23 = vector.broadcast %cst_24 : f32 to vector<4x2xf32>
      %24 = arith.maximumf %22, %23 : vector<4x2xf32>
      %cst_25 = arith.constant dense<0.000000e+00> : vector<4x32xf32>
      %25 = tpu.matmul %24, %21, %cst_25 {dimension_numbers = #tpu.dot_dimension_numbers<[1], [0], [0], [1], [0, 0, 1, 1], [], []>} : vector<4x2xf32>, vector<2x32xf32>, vector<4x32xf32> -> vector<4x32xf32>
      %26 = vector.extract_strided_slice %25 {offsets = [0, 0], sizes = [2, 32], strides = [1, 1]} : vector<4x32xf32> to vector<2x32xf32>
      %27 = vector.extract_strided_slice %25 {offsets = [2, 0], sizes = [2, 32], strides = [1, 1]} : vector<4x32xf32> to vector<2x32xf32>
      %28 = arith.addf %26, %27 : vector<2x32xf32>
      %29 = arith.negf %28 : vector<2x32xf32>
      %30 = math.exp %29 : vector<2x32xf32>
      %cst_26 = arith.constant 1.000000e+00 : f32
      %31 = vector.broadcast %cst_26 : f32 to vector<2x32xf32>
      %32 = arith.addf %31, %30 : vector<2x32xf32>
      %33 = arith.divf %31, %32 : vector<2x32xf32>
      %c0_27 = arith.constant 0 : index
      %c0_28 = arith.constant 0 : index
      %34 = vector.load %arg5[%c0_27, %c0_28] : memref<2x32xf32, #tpu.memory_space<vmem>>, vector<2x32xf32>
      tpu.vector_store %arg5[%c0_27, %c0_28], %33 {strides = array<i32>} : memref<2x32xf32, #tpu.memory_space<vmem>>, vector<2x32xf32>,
    } else {
    }
    return
  }
  func.func @transform_0(%arg0: i32, %arg1: i32) -> (i32, i32, i32) {
    %c0_i32 = arith.constant 0 : i32
    %c0_i32_0 = arith.constant 0 : i32
    return %arg0, %c0_i32, %arg1 : i32, i32, i32
  }
  func.func @transform_1(%arg0: i32, %arg1: i32) -> (i32, i32) {
    %c0_i32 = arith.constant 0 : i32
    %c0_i32_0 = arith.constant 0 : i32
    %c0_i32_1 = arith.constant 0 : i32
    return %c0_i32, %c0_i32_0 : i32, i32
  }
  func.func @transform_2(%arg0: i32, %arg1: i32) -> (i32, i32) {
    %c0_i32 = arith.constant 0 : i32
    %c0_i32_0 = arith.constant 0 : i32
    %c0_i32_1 = arith.constant 0 : i32
    return %c0_i32, %c0_i32_0 : i32, i32
  }
  func.func @transform_3(%arg0: i32, %arg1: i32) -> (i32, i32) {
    %c0_i32 = arith.constant 0 : i32
    %c0_i32_0 = arith.constant 0 : i32
    return %arg0, %c0_i32 : i32, i32
  }
}

</mosaic_0001>

<bundles_post_ra>
// kernel: tpu_custom_call.1
= control target key start
LH: loop header
LB: loop body
LE: loop exit
PB: predicated region body
PF: predicated region fallthrough
CT: control target
= control target key end

     0   :  { %8 = vsyncpa [#allocation5], 0  ;;  %s407_s0 = inlined_call_operand.hbm [shape: f32[2,32,256], index: 0, kind: input, shape index: {}]   ;;  %s408_s1 = inlined_call_operand.vmem [shape: f32[32,2], index: 1, kind: input, shape index: {}]   ;;  %s409_s2 = inlined_call_operand.vmem [shape: f32[2,32], index: 2, kind: input, shape index: {}]   ;;  %s410_s3 = inlined_call_operand.hbm [shape: f32[2,32], index: 3, kind: output, shape index: {}]  }
   0x1   :  { %9 = vsyncpa [#allocation6], 0  ;;  %s14_s14 = sshll.u32 %s407_s0, 4  ;;  %s341_s15 = smov [#allocation4]   ;;  %s15_s14 = int_to_ptr.hbm [resolvable:$true] %s14_s14 }
   0x2   :  { %s16_s16 = sshll.u32 %s341_s15, 4  ;;  %s342_s17 = smov 256   ;;  %s17_s16 = int_to_ptr.vmem [resolvable:$true] %s16_s16 }
   0x3   :  { %s343_s18 = smov 16  }
   0x4   :  { %22 = dma.hbm_to_vmem [thread:$0]  %s15_s14, 2048, %s17_s16, [#allocation5], %s342_s17, %s342_s17, %s343_s18  }
   0x5   :  { %337 = dma.done.wait [#allocation5], 2048  }
   0x6   :  { %338 = vsyncadd [#allocation5], 4294965248  ;;  %v46_v0 = vld [vmem:[#allocation4 + $0x40] sm:$0xff]  ;;  %v47_v1 = vld [vmem:[#allocation4 + $0x48] sm:$0xff]  ;;  %vm35_vm0 = vcmask 254976   ;;  %v344_v32 = vmov 0.0   ;;  %v87_v46 = vlaneseq }
   0x7   :  { %v38_v2 = vld [vmem:[#allocation4] sm:$0xff]  ;;  %v67_v3 = vadd.f32 %v47_v1, %v46_v0  ;;  %v39_v4 = vld [vmem:[#allocation4 + $0x8] sm:$0xff]  ;;  %v48_v7 = vld [vmem:[#allocation4 + $0x50] sm:$0xff]  ;;  %v128_v18 = vmax.f32 %v46_v0, %v47_v1  ;;  %36 = vst.msk [vmem:[#allocation2] sm:$0x3] %vm35_vm0, %v344_v32  ;;  %v345_v36 = vmov -inf  }
   0x8   :  { %v116_v5 = vmax.f32 %v38_v2, %v39_v4  ;;  %v55_v6 = vadd.f32 %v39_v4, %v38_v2  ;;  %v49_v8 = vld [vmem:[#allocation4 + $0x58] sm:$0xff]  ;;  %v40_v9 = vld [vmem:[#allocation4 + $0x10] sm:$0xff]  ;;  %v42_v14 = vld [vmem:[#allocation4 + $0x20] sm:$0xff]  ;;  %37 = vst.msk [vmem:[#allocation3] sm:$0x3] %vm35_vm0, %v345_v36  ;;  %v88_v48 = vand.u32 127, %v87_v46 }
   0x9   :  { %68 = vadd.xlane.f32.xlu1 %v67_v3  ;;  %v41_v10 = vld [vmem:[#allocation4 + $0x18] sm:$0xff]  ;;  %v70_v11 = vadd.f32 %v49_v8, %v48_v7  ;;  %v43_v15 = vld [vmem:[#allocation4 + $0x28] sm:$0xff]  ;;  %v131_v16 = vmax.f32 %v48_v7, %v49_v8  ;;  %v50_v19 = vld [vmem:[#allocation4 + $0x60] sm:$0xff]  ;;  %vm92_vm1 = vcmask 130112   ;;  %vm96_vm2 = vcmask 195712   ;;  %s265_s30 = sshll.u32 %s410_s3, 4  ;;  %s266_s30 = int_to_ptr.hbm [resolvable:$true] %s265_s30 }
   0xa   :  { %117 = vmax.xlane.f32.xlu2 %v116_v5  ;;  %56 = vadd.xlane.f32.xlu0 %v55_v6  ;;  %v119_v12 = vmax.f32 %v40_v9, %v41_v10  ;;  %v58_v13 = vadd.f32 %v41_v10, %v40_v9  ;;  %v61_v17 = vadd.f32 %v43_v15, %v42_v14  ;;  %v51_v20 = vld [vmem:[#allocation4 + $0x68] sm:$0xff]  ;;  %v52_v24 = vld [vmem:[#allocation4 + $0x70] sm:$0xff]  ;;  %v53_v25 = vld [vmem:[#allocation4 + $0x78] sm:$0xff]  ;;  %v90_v50 = vadd.s32 4294967288, %v88_v48 }
   0xb   :  { %v122_v21 = vmax.f32 %v42_v14, %v43_v15  ;;  %v134_v22 = vmax.f32 %v50_v19, %v51_v20  ;;  %v73_v23 = vadd.f32 %v51_v20, %v50_v19  ;;  %v44_v26 = vld [vmem:[#allocation4 + $0x30] sm:$0xff]  ;;  %v45_v27 = vld [vmem:[#allocation4 + $0x38] sm:$0xff]  ;;  %v76_v28 = vadd.f32 %v53_v25, %v52_v24  ;;  %v178_v45 = vld [vmem:[%s408_s1 + $0x8] sm:$0xff] }
   0xc   :  { %v125_v29 = vmax.f32 %v44_v26, %v45_v27  ;;  %v64_v30 = vadd.f32 %v45_v27, %v44_v26  ;;  %v137_v31 = vmax.f32 %v52_v24, %v53_v25  ;;  %v180_v41 = vld [vmem:[%s408_s1 + $0x18] sm:$0xff]  ;;  %v179_v42 = vld [vmem:[%s408_s1 + $0x10] sm:$0xff]  ;;  %v177_v47 = vld [vmem:[%s408_s1] sm:$0xff]  ;;  %v94_v52 = vadd.s32 4294967280, %v88_v48 }
   0xd   :  { %198 = vmatpush.msra.mxu0 %v180_v41  ;;  %v98_v56 = vadd.s32 4294967272, %v88_v48  ;;  %vm100_vm3 = vcmask 261312   ;;  %vm109_vm4 = vcmask 1041409   ;;  %vm175_vm5 = vcmask 1041408  }
   0xe   :  { %v54_v6 = vld [vmem:[#allocation2] sm:$0x3]  ;;  %vm182_vm6 = vcmask 261120   ;;  %vm207_vm7 = vcmask 15360  }
   0xf   :  { %199 = vmatpush.msra.mxu0 %v179_v42  ;;  %v115_v24 = vld [vmem:[#allocation3] sm:$0x3] }
  0x11   :  { %71 = vadd.xlane.f32.xlu1 %v70_v11  ;;  %200 = vmatpush.msra.mxu0 %v178_v45 }
  0x12   :  { %120 = vmax.xlane.f32.xlu2 %v119_v12  ;;  %59 = vadd.xlane.f32.xlu0 %v58_v13 }
  0x13   :  { %201 = vmatpush.msra.mxu0 %v177_v47 }
  0x19   :  { %132 = vmax.xlane.f32.xlu1 %v131_v16 }
  0x1a   :  { %62 = vadd.xlane.f32.xlu2 %v61_v17  ;;  %129 = vmax.xlane.f32.xlu0 %v128_v18 }
  0x21   :  { %123 = vmax.xlane.f32.xlu1 %v122_v21 }
  0x22   :  { %135 = vmax.xlane.f32.xlu2 %v134_v22  ;;  %74 = vadd.xlane.f32.xlu0 %v73_v23 }
  0x29   :  { %77 = vadd.xlane.f32.xlu1 %v76_v28 }
  0x2a   :  { %126 = vmax.xlane.f32.xlu2 %v125_v29  ;;  %65 = vadd.xlane.f32.xlu0 %v64_v30 }
  0x32   :  { %138 = vmax.xlane.f32.xlu0 %v137_v31 }
  0x7c   :  { %v69_v33 = vpop.xlane.xlu1 %68 }
  0x7d   :  { %v118_v34 = vpop.xlane.xlu2 %117  ;;  %v57_v35 = vpop.xlane.xlu0 %56  ;;  %v102_v54 = vperm.slane %v69_v33, %v88_v48 }
  0x7e   :  { %v89_v60 = vperm.slane %v57_v35, %v88_v48  ;;  %v148_v8 = vperm.slane %v118_v34, %v88_v48  ;;  %v181_v34 = vld [vmem:[%s409_s2] sm:$0x3]  ;;  %s346_s2 = smov [#allocation7]  }
  0x7f   :  { %276 = vmatpush.msk.msra.mxu1 %vm175_vm5, %v181_v34  ;;  %s263_s27 = sshll.u32 %s346_s2, 4  ;;  %s264_s27 = int_to_ptr.vmem [resolvable:$true] %s263_s27 }
  0x84   :  { %v72_v37 = vpop.xlane.xlu1 %71 }
  0x85   :  { %v121_v38 = vpop.xlane.xlu2 %120  ;;  %v60_v39 = vpop.xlane.xlu0 %59  ;;  %v103_v55 = vperm.slane %v72_v37, %v90_v50 }
  0x86   :  { %v91_v57 = vperm.slane %v60_v39, %v90_v50  ;;  %v149_v11 = vperm.slane %v121_v38, %v90_v50 }
  0x87   :  { %v104_v62 = vsel %vm92_vm1, %v103_v55, %v102_v54 }
  0x88   :  { %v93_v1 = vsel %vm92_vm1, %v91_v57, %v89_v60  ;;  %v150_v19 = vsel %vm92_vm1, %v149_v11, %v148_v8 }
  0x8c   :  { %v133_v40 = vpop.xlane.xlu1 %132 }
  0x8d   :  { %v63_v43 = vpop.xlane.xlu2 %62  ;;  %v130_v44 = vpop.xlane.xlu0 %129  ;;  %v156_v12 = vperm.slane %v133_v40, %v90_v50 }
  0x8e   :  { %v95_v59 = vperm.slane %v63_v43, %v94_v52  ;;  %v155_v13 = vperm.slane %v130_v44, %v88_v48 }
  0x90   :  { %v97_v4 = vsel %vm96_vm2, %v95_v59, %v93_v1  ;;  %v157_v20 = vsel %vm92_vm1, %v156_v12, %v155_v13 }
  0x94   :  { %v124_v49 = vpop.xlane.xlu1 %123 }
  0x95   :  { %v75_v51 = vpop.xlane.xlu0 %74  ;;  %v136_v53 = vpop.xlane.xlu2 %135  ;;  %v151_v15 = vperm.slane %v124_v49, %v94_v52 }
  0x96   :  { %v105_v58 = vperm.slane %v75_v51, %v94_v52  ;;  %v158_v16 = vperm.slane %v136_v53, %v94_v52 }
  0x97   :  { %v152_v22 = vsel %vm96_vm2, %v151_v15, %v150_v19 }
  0x98   :  { %v106_v2 = vsel %vm96_vm2, %v105_v58, %v104_v62  ;;  %v159_v23 = vsel %vm96_vm2, %v158_v16, %v157_v20 }
  0x9c   :  { %v78_v61 = vpop.xlane.xlu1 %77 }
  0x9d   :  { %v107_v63 = vperm.slane %v78_v61, %v98_v56  ;;  %v66_v0 = vpop.xlane.xlu0 %65  ;;  %v127_v9 = vpop.xlane.xlu2 %126 }
  0x9e   :  { %v99_v3 = vperm.slane %v66_v0, %v98_v56  ;;  %v153_v17 = vperm.slane %v127_v9, %v98_v56 }
  0x9f   :  { %v108_v5 = vsel %vm100_vm3, %v107_v63, %v106_v2 }
  0xa0   :  { %v101_v7 = vsel %vm100_vm3, %v99_v3, %v97_v4  ;;  %v154_v25 = vsel %vm100_vm3, %v153_v17, %v152_v22 }
  0xa1   :  { %v110_v10 = vsel %vm109_vm4, %v108_v5, %v101_v7 }
  0xa2   :  { %v112_v14 = vadd.f32 %v110_v10, %v54_v6 }
  0xa4   :  { %114 = vst.msk [vmem:[#allocation2] sm:$0x3] %vm35_vm0, %v112_v14 }
  0xa5   :  { %v139_v18 = vpop.xlane.xlu0 %138 }
  0xa6   :  { %v160_v21 = vperm.slane %v139_v18, %v98_v56 }
  0xa8   :  { %v161_v26 = vsel %vm100_vm3, %v160_v21, %v159_v23 }
  0xa9   :  { %v162_v27 = vsel %vm109_vm4, %v161_v26, %v154_v25 }
  0xaa   :  { %v164_v28 = vmax.f32 %v115_v24, %v162_v27 }
  0xab   :  { %v169_v29 = vld [vmem:[#allocation2] sm:$0x3] }
  0xac   :  { %165 = vst.msk [vmem:[#allocation3] sm:$0x3] %vm35_vm0, %v164_v28  ;;  %v170_v31 = vmul.f32 0.00390625, %v169_v29 }
  0xb3   :  { %v171_v30 = vld [vmem:[#allocation3] sm:$0x3] }
  0xb4   :  { %v173_v32 = vrot.slane %v171_v30, 6 }
  0xb6   :  { %v176_v33 = vsel %vm175_vm5, %v170_v31, %v173_v32 }
  0xb7   :  { %275 = vmatmul.msk.f32.vlgmr.msra.gmra.mxu0 %vm182_vm6, %v176_v33 }
 0x134   :  { %v203_v35 = vpop.f32.mrf.mxu0 }
 0x135   :  { %v206_v36 = vmax.f32 %v203_v35, 0.0 }
 0x137   :  { %277 = vmatmul.msk.f32.vlgmr.msra.gmra.mxu1 %vm207_vm7, %v206_v36 }
 0x1b4   :  { %v231_v37 = vpop.f32.mrf.mxu1 }
 0x1b5   :  { %v235_v38 = vrot.slane %v231_v37, 2 }
 0x1b7   :  { %v237_v39 = vadd.f32 %v235_v38, %v231_v37 }
 0x1b9   :  { %v278_v40 = vmul.f32 -1.442695, %v237_v39 }
 0x1bb   :  { %285 = vpow2.f32 %v278_v40 }
 0x1c1   :  { %v286_v41 = vpop.eup %285 }
 0x1c2   :  { %v241_v42 = vadd.f32 1.0, %v286_v41 }
 0x1c4   :  { %287 = vrcp.f32 %v241_v42  ;;  %v253_v46 = vand.u32 2147483648, %v241_v42  ;;  %v251_v48 = vand.u32 2147483647, %v241_v42  ;;  %vm247_vm9 = vweird.f32 %v241_v42 }
 0x1c6   :  { %v254_v50 = vor.u32 1.1754944e-38, %v253_v46  ;;  %vm252_vm11 = vcmp.eq.f32.partialorder %v251_v48, 8.507059e+37 }
 0x1ca   :  { %v288_v43 = vpop.eup %287 }
 0x1cb   :  { %v243_v44 = vmul.f32 %v288_v43, %v241_v42  ;;  %vm248_vm8 = vweird.f32 %v288_v43 }
 0x1cc   :  { %vm249_vm10 = vmor %vm247_vm9, %vm248_vm8 }
 0x1cd   :  { %v244_v45 = vsub.f32 1.0, %v243_v44 }
 0x1cf   :  { %v245_v47 = vmul.f32 %v288_v43, %v244_v45 }
 0x1d1   :  { %v246_v49 = vadd.f32 %v288_v43, %v245_v47 }
 0x1d3   :  { %v250_v51 = vsel %vm249_vm10, %v288_v43, %v246_v49 }
 0x1d4   :  { %v255_v52 = vsel %vm252_vm11, %v254_v50, %v250_v51 }
 0x1d5   :  { %257 = vst.msk [vmem:[#allocation7] sm:$0x3] %vm35_vm0, %v255_v52 }
 0x1d6   :  { %268 = dma.vmem_to_hbm [thread:$0]  %s264_s27, 32, %s266_s30, [#allocation6]  }
 0x1d7   :  { %339 = dma.done.wait [#allocation6], 32  }
 0x1d8   :  { %340 = vsyncadd [#allocation6], 4294967264 }
 0x1d9   :  { %273 = vsyncpa [#allocation5], 1 }
 0x1da   :  { %274 = vsyncpa [#allocation6], 1 }

</bundles_post_ra>
